<compile_context>
chip_gen: v7x
topology: tpu7x:2x2x1
jax: 0.10.0
libtpu: 0.0.40
codegen_flags: <defaults>
</compile_context>

<pallas_src>
import jax
import jax.numpy as jnp
from jax.experimental import pallas as pl
from jax.experimental.pallas import tpu as pltpu


def _user_forward(gender_idx, age_idx, occupation_idx, area_idx,
                  emb_gender, emb_age, emb_occupation, emb_area):
    """Pallas equivalent of user.forward: returns [B, 4*embedding_dim] f32."""
    B = gender_idx.shape[0]
    D = emb_gender.shape[1]
    ng = emb_gender.shape[0]
    na = emb_age.shape[0]
    no = emb_occupation.shape[0]
    nz = emb_area.shape[0]

    # Row offsets of each table inside the fused weight.
    off_g = 0
    off_a = ng
    off_o = ng + na
    off_z = ng + na + no
    r_raw = ng + na + no + nz
    R = ((r_raw + 7) // 8) * 8          # pad contraction dim to sublane multiple

    # Block-placed fused weight: multi-hot @ W == concat of the four lookups.
    W = jnp.zeros((R, 4 * D), jnp.float32)
    W = W.at[off_g:off_g + ng, 0 * D:1 * D].set(emb_gender.astype(jnp.float32))
    W = W.at[off_a:off_a + na, 1 * D:2 * D].set(emb_age.astype(jnp.float32))
    W = W.at[off_o:off_o + no, 2 * D:3 * D].set(emb_occupation.astype(jnp.float32))
    W = W.at[off_z:off_z + nz, 3 * D:4 * D].set(emb_area.astype(jnp.float32))

    # Single int32 index slab; column k carries field k's index shifted into
    # its fused-row range.
    idx = jnp.stack(
        [gender_idx.astype(jnp.int32) + off_g,
         age_idx.astype(jnp.int32) + off_a,
         occupation_idx.astype(jnp.int32) + off_o,
         area_idx.astype(jnp.int32) + off_z], axis=1)           # (B, 4)

    # Batch tile: multiple of 8; capped so the (TB, R) selector plus the
    # double-buffered (TB, 4*D) output tiles stay a few MiB at most.
    cap = max(8, ((4 * 1024 * 1024) // (4 * max(R, 4 * D))) // 8 * 8)
    TB = min(2048, cap, max(8, ((B + 7) // 8) * 8))
    n_tiles = (B + TB - 1) // TB
    B_pad = n_tiles * TB
    if B_pad != B:
        # Pad with -1 so padded rows select no fused row (zeros).
        idx = jnp.pad(idx, ((0, B_pad - B), (0, 0)), constant_values=-1)

    def kernel(idx_ref, w_ref, out_ref):
        # Column iota over the fused-row axis.
        col = jax.lax.broadcasted_iota(jnp.int32, (TB, R), 1)
        ix = idx_ref[...]                                       # (TB, 4)
        # Disjoint row ranges -> OR-tree builds the multi-hot selector with a
        # single bool->f32 cast.
        sel = ((col == ix[:, 0:1]) | (col == ix[:, 1:2])
               | (col == ix[:, 2:3]) | (col == ix[:, 3:4])).astype(jnp.float32)
        # Fused lookup + concat on the MXU -> lane-dense (TB, 4*D) tile.
        out_ref[...] = jnp.dot(sel, w_ref[...],
                               preferred_element_type=jnp.float32)

    out = pl.pallas_call(
        kernel,
        out_shape=jax.ShapeDtypeStruct((B_pad, 4 * D), jnp.float32),
        grid_spec=pl.GridSpec(
            grid=(n_tiles,),
            in_specs=[pl.BlockSpec((TB, 4), lambda i: (i, 0)),
                      pl.BlockSpec((R, 4 * D), lambda i: (0, 0))],  # resident
            out_specs=pl.BlockSpec((TB, 4 * D), lambda i: (i, 0)),  # lane-dense
        ),
        compiler_params=pltpu.CompilerParams(
            dimension_semantics=("parallel",)),
    )(idx, W)

    return out[:B]


# Jit the wrapper so the fused-weight assembly / index packing fuse into the
# surrounding graph and the pallas_call is compiled once per shape.
user_forward = jax.jit(_user_forward)


if __name__ == "__main__":
    # Config (small, consistent with the module's __init__)
    num_gender = 2
    num_age = 7
    num_occupation = 21
    num_zipcode = 16
    embedding_dim = 32
    batch = 8

    key = jax.random.PRNGKey(0)
    k_g, k_a, k_o, k_z, k_ig, k_ia, k_io, k_iz = jax.random.split(key, 8)

    # Deterministic parameter init (torch.nn.Embedding default: N(0, 1)).
    emb_gender = jax.random.normal(k_g, (num_gender, embedding_dim), jnp.float32)
    emb_age = jax.random.normal(k_a, (num_age, embedding_dim), jnp.float32)
    emb_occupation = jax.random.normal(
        k_o, (num_occupation, embedding_dim), jnp.float32)
    emb_area = jax.random.normal(k_z, (num_zipcode, embedding_dim), jnp.float32)

    # Deterministic example indices.
    gender_idx = jax.random.randint(k_ig, (batch,), 0, num_gender, jnp.int32)
    age_idx = jax.random.randint(k_ia, (batch,), 0, num_age, jnp.int32)
    occupation_idx = jax.random.randint(
        k_io, (batch,), 0, num_occupation, jnp.int32)
    area_idx = jax.random.randint(k_iz, (batch,), 0, num_zipcode, jnp.int32)

    out = user_forward(gender_idx, age_idx, occupation_idx, area_idx,
                       emb_gender, emb_age, emb_occupation, emb_area)
    out = jax.block_until_ready(out)

    # Cross-check against plain-JAX reference (same semantics as torch.cat of lookups).
    ref = jnp.concatenate(
        [emb_gender[gender_idx], emb_age[age_idx],
         emb_occupation[occupation_idx], emb_area[area_idx]], axis=1)
    assert out.shape == (batch, 4 * embedding_dim)
    assert jnp.allclose(out, ref, atol=1e-6), "Pallas output mismatch vs reference"

    print("KERNEL_OK")
</pallas_src>

<mosaic_0001>
module attributes {stable_mosaic.version = 11 : i64} {
  func.func @kernel(%arg0: i32, %arg1: memref<8x4xi32, #tpu.memory_space<vmem>>, %arg2: memref<48x128xf32, #tpu.memory_space<vmem>>, %arg3: memref<8x128xf32, #tpu.memory_space<vmem>>) attributes {dimension_semantics = [#tpu.dimension_semantics<parallel>], iteration_bounds = array<i64: 1>, scalar_prefetch = 0 : i64, scratch_operands = 0 : i64, tpu.core_type = #tpu.core_type<tc>, window_params = [{transform_indices = @transform_0, window_bounds = array<i64: 8, 4>}, {pipeline_mode = #tpu.pipeline_mode<synchronous>, transform_indices = @transform_1, window_bounds = array<i64: 48, 128>}, {transform_indices = @transform_2, window_bounds = array<i64: 8, 128>}]} {
    %0 = tpu.iota {dimensions = array<i32: 1>} : vector<8x48xi32>
    %c0 = arith.constant 0 : index
    %c0_0 = arith.constant 0 : index
    %1 = vector.load %arg1[%c0, %c0_0] : memref<8x4xi32, #tpu.memory_space<vmem>>, vector<8x4xi32>
    %2 = vector.extract_strided_slice %1 {offsets = [0, 0], sizes = [8, 1], strides = [1, 1]} : vector<8x4xi32> to vector<8x1xi32>
    %3 = vector.broadcast %2 : vector<8x1xi32> to vector<8x48xi32>
    %4 = arith.cmpi eq, %0, %3 : vector<8x48xi32>
    %5 = vector.extract_strided_slice %1 {offsets = [0, 1], sizes = [8, 1], strides = [1, 1]} : vector<8x4xi32> to vector<8x1xi32>
    %6 = vector.broadcast %5 : vector<8x1xi32> to vector<8x48xi32>
    %7 = arith.cmpi eq, %0, %6 : vector<8x48xi32>
    %8 = arith.ori %4, %7 : vector<8x48xi1>
    %9 = vector.extract_strided_slice %1 {offsets = [0, 2], sizes = [8, 1], strides = [1, 1]} : vector<8x4xi32> to vector<8x1xi32>
    %10 = vector.broadcast %9 : vector<8x1xi32> to vector<8x48xi32>
    %11 = arith.cmpi eq, %0, %10 : vector<8x48xi32>
    %12 = arith.ori %8, %11 : vector<8x48xi1>
    %13 = vector.extract_strided_slice %1 {offsets = [0, 3], sizes = [8, 1], strides = [1, 1]} : vector<8x4xi32> to vector<8x1xi32>
    %14 = vector.broadcast %13 : vector<8x1xi32> to vector<8x48xi32>
    %15 = arith.cmpi eq, %0, %14 : vector<8x48xi32>
    %16 = arith.ori %12, %15 : vector<8x48xi1>
    %17 = arith.extui %16 : vector<8x48xi1> to vector<8x48xi32>
    %18 = arith.sitofp %17 : vector<8x48xi32> to vector<8x48xf32>
    %c0_1 = arith.constant 0 : index
    %c0_2 = arith.constant 0 : index
    %19 = vector.load %arg2[%c0_1, %c0_2] : memref<48x128xf32, #tpu.memory_space<vmem>>, vector<48x128xf32>
    %cst = arith.constant dense<0.000000e+00> : vector<8x128xf32>
    %20 = tpu.matmul %18, %19, %cst {dimension_numbers = #tpu.dot_dimension_numbers<[1], [0], [0], [1], [0, 0, 1, 1], [], []>} : vector<8x48xf32>, vector<48x128xf32>, vector<8x128xf32> -> vector<8x128xf32>
    %c0_3 = arith.constant 0 : index
    %c0_4 = arith.constant 0 : index
    %21 = vector.load %arg3[%c0_3, %c0_4] : memref<8x128xf32, #tpu.memory_space<vmem>>, vector<8x128xf32>
    tpu.vector_store %arg3[%c0_3, %c0_4], %20 {strides = array<i32>} : memref<8x128xf32, #tpu.memory_space<vmem>>, vector<8x128xf32>,
    return
  }
  func.func @transform_0(%arg0: i32) -> (i32, i32) {
    %c0_i32 = arith.constant 0 : i32
    %c0_i32_0 = arith.constant 0 : i32
    return %arg0, %c0_i32 : i32, i32
  }
  func.func @transform_1(%arg0: i32) -> (i32, i32) {
    %c0_i32 = arith.constant 0 : i32
    %c0_i32_0 = arith.constant 0 : i32
    %c0_i32_1 = arith.constant 0 : i32
    return %c0_i32, %c0_i32_0 : i32, i32
  }
  func.func @transform_2(%arg0: i32) -> (i32, i32) {
    %c0_i32 = arith.constant 0 : i32
    %c0_i32_0 = arith.constant 0 : i32
    return %arg0, %c0_i32 : i32, i32
  }
}

</mosaic_0001>

<bundles_post_ra>
// kernel: _user_forward.1
= control target key start
LH: loop header
LB: loop body
LE: loop exit
PB: predicated region body
PF: predicated region fallthrough
CT: control target
= control target key end

     0   :  { %v201_v2 = vmov 0   ;;  %v202_v3 = vmov 2   ;;  %s257_s0 = inlined_call_operand.vmem [shape: s32[8,4], index: 0, kind: input, shape index: {}]   ;;  %s258_s1 = inlined_call_operand.vmem [shape: f32[48,128], index: 1, kind: input, shape index: {}]   ;;  %s259_s2 = inlined_call_operand.hbm [shape: f32[8,128], index: 2, kind: output, shape index: {}]  }
   0x1   :  { %v14_v0 = vld [vmem:[%s257_s0] sm:$0xff]  ;;  %172 = vset.pattern.permute.xlu0 %v201_v2  ;;  %174 = vset.pattern.permute.xlu1 %v202_v3  ;;  %v37_v4 = vld [vmem:[%s258_s1 + $0x8] sm:$0xff] }
   0x2   :  { %v36_v1 = vld [vmem:[%s258_s1] sm:$0xff] }
   0x3   :  { %7 = vsyncpa [#allocation3], 0  ;;  %16 = vperm.xlu0 %172, %v14_v0   ;;  %25 = vperm.xlu1 %174, %v14_v0   ;;  %v156_v5 = vpack.c.bf16 %v37_v4, %v36_v1  ;;  %v38_v6 = vld [vmem:[%s258_s1 + $0x10] sm:$0xff]  ;;  %v39_v7 = vld [vmem:[%s258_s1 + $0x18] sm:$0xff]  ;;  %v203_v8 = vmov 0.0|0.0   ;;  %v204_v10 = vmov 1   ;;  %v12_v16 = vlaneseq }
   0x4   :  { %155 = vmatprep.subr.bf16.mxu0 %v203_v8  ;;  %v159_v9 = vpack.c.bf16 %v39_v7, %v38_v6  ;;  %v205_v11 = vmov 3   ;;  %v40_v12 = vld [vmem:[%s258_s1 + $0x20] sm:$0xff]  ;;  %v41_v13 = vld [vmem:[%s258_s1 + $0x28] sm:$0xff]  ;;  %vm206_vm0 = vmmov 0   ;;  %v207_v15 = vmov 0.0   ;;  %s208_s1 = smov [#allocation2]  }
   0x5   :  { %157 = vmatpush3.bf16.msra.mxu0 %v156_v5  ;;  %v162_v14 = vpack.c.bf16 %v41_v13, %v40_v12  ;;  %152 = vmatprep.mubr.msk.f32.mxu0 %vm206_vm0, %v207_v15  ;;  %v13_v19 = vand.u32 127, %v12_v16  ;;  %vm42_vm7 = vcmask 392192   ;;  %s123_s22 = sshll.u32 %s208_s1, 4  ;;  %s124_s22 = int_to_ptr.vmem [resolvable:$true] %s123_s22 }
   0x6   :  { %158 = vmatprep.subr.bf16.mxu0 %v203_v8  ;;  %s177_s23 = scalar_lea.vmem %s124_s22, 128  ;;  %p182_p1 = scmp.lt.s32.totalorder %s124_s22, %s124_s22 }
   0x7   :  { %173 = vset.pattern.permute.xlu0 %v204_v10  ;;  %175 = vset.pattern.permute.xlu1 %v205_v11  ;;  %p178_p0 = scmp.ne.s32.totalorder %s124_s22, %s177_s23  ;;  %p183_p2 = scmp.lt.s32.totalorder %s177_s23, %s177_s23 }
   0x8   :  { %20 = vperm.xlu0 %173, %v14_v0   ;;  %30 = vperm.xlu1 %175, %v14_v0  }
   0x9   :  { %160 = vmatpush3.bf16.msra.mxu0 %v159_v9  ;;  %p184_p3 = por %p183_p2, %p182_p1 }
   0xa   :  { %161 = vmatprep.subr.bf16.mxu0 %v203_v8 }
   0xb   :  { %p185_p4 = pnand %p184_p3, %p178_p0 }
   0xc   :  { %176 = vset.pattern.permute.xlu0 %v205_v11 }
   0xd   :  { %163 = vmatpush3.bf16.msra.mxu0 %v162_v14 }
  0x82   :  { %v17_v17 = vpop.permute.xlu0 %16  ;;  %v26_v18 = vpop.permute.xlu1 %25 }
  0x83   :  { %vm18_vm1 = vcmp.eq.s32.totalorder %v13_v19, %v17_v17  ;;  %vm27_vm4 = vcmp.eq.s32.totalorder %v13_v19, %v26_v18 }
  0x87   :  { %v21_v20 = vpop.permute.xlu0 %20  ;;  %v31_v21 = vpop.permute.xlu1 %30 }
  0x88   :  { %vm22_vm2 = vcmp.eq.s32.totalorder %v13_v19, %v21_v20  ;;  %vm32_vm3 = vcmp.eq.s32.totalorder %v13_v19, %v31_v21 }
  0x89   :  { %vm23_vm5 = vmor %vm18_vm1, %vm22_vm2 }
  0x8a   :  { %vm28_vm6 = vmor %vm23_vm5, %vm27_vm4 }
  0x8b   :  { %vm33_vm8 = vmor %vm28_vm6, %vm32_vm3 }
  0x8c   :  { %v131_v22 = vsel %vm33_vm8, 1.0, %v207_v15 }
  0x8d   :  { %153 = vmatmul.mubr.msk.f32.vlgmr.msra.gmra.mrb[0].mxu0 %vm42_vm7, %v131_v22 }
 0x160   :  { %v112_v23 = vpop.f32.mrb[0].mxu0 }
 0x161   :  { %116 = vst [vmem:[#allocation2] sm:$0xff] %v112_v23  ;;  %v154_v24 = vpop.f32.mrb[1].mxu0 }
 0x162   :  { %188 = shalt.err (!%p185_p4)
}
 0x163   :  { %s189_s26 = scalar_lea.hbm %s259_s2, 128 }
 0x164   :  { %p190_p5 = scmp.ne.s32.totalorder %s259_s2, %s189_s26  ;;  %p193_p6 = scmp.lt.u32.totalorder %s189_s26, %s259_s2 }
 0x166   :  { %p195_p7 = pnand %p193_p6, %p190_p5 }
 0x168   :  { %198 = shalt.err (!%p195_p7)
}
 0x169   :  { %126 = dma.vmem_to_hbm [thread:$0]  %s124_s22, 128, %s259_s2, [#allocation3]  }
 0x16a   :  { %199 = dma.done.wait [#allocation3], 128  }
 0x16b   :  { %200 = vsyncadd [#allocation3], 4294967168 }
 0x16c   :  { %130 = vsyncpa [#allocation3], 1 }

</bundles_post_ra>
